<compile_context>
chip_gen: v5e
topology: v5e:2x2
jax: 0.10.0
libtpu: 0.0.40
codegen_flags: <defaults>
</compile_context>

<pallas_src>
import jax
import jax.numpy as jnp
from jax import lax
from jax.experimental import pallas as pl
from jax.experimental.pallas import tpu as pltpu

_LANE = 128

# Constant-folded fused parameters (see derivation above).
_WA_DIAG = 9.0   # (1+2+3) + 3*eye -> diagonal taps of the fused 2x2 conv
_WA_OFF = 6.0    # off-diagonal taps
_BA = -6.0       # 3 * (-2)
_WB_TAP = 6.0    # 3 identical channels * 2 (from 2*eye(3)); bias 0


# ----------------------------------------------------------------------------
# Pallas kernel: fused conv(2x2,1->3) -> ReLU -> conv(3x3,3->1), batch on lanes
# ----------------------------------------------------------------------------
def _branching_kernel(x_ref, o_ref):
    # x_ref: VMEM (H, W, BN) f32   (batch on the lane axis)
    # o_ref: VMEM (H-3, W-3, BN) f32
    x = x_ref[...]
    H, W, _ = x.shape
    H1, W1 = H - 1, W - 1
    Ho, Wo = H - 3, W - 3

    # Stage 1: fused conv1+conv2+conv3 (2x2) + bias, ReLU. Single feature map.
    y = (_WA_DIAG * (x[0:H1, 0:W1] + x[1:H, 1:W])
         + _WA_OFF * (x[0:H1, 1:W] + x[1:H, 0:W1])
         + _BA)
    y = jnp.maximum(y, 0.0)

    # Stage 2: fused conv4+conv5 (3x3) -> only the 3 diagonal taps are nonzero.
    o_ref[...] = _WB_TAP * (y[0:Ho, 0:Wo]
                            + y[1:Ho + 1, 1:Wo + 1]
                            + y[2:Ho + 2, 2:Wo + 2])


# ----------------------------------------------------------------------------
# Wrapper: layout plumbing (NCHW -> (H, W, N_padded)) + pallas_call
# ----------------------------------------------------------------------------
@jax.jit
def pruning_branching_forward(x_nchw):
    """x_nchw: (N, 1, H, W) float32 -> (N, 1, H-3, W-3) float32 (matches PyTorch)."""
    N, C, H, W = x_nchw.shape
    assert C == 1
    Ho, Wo = H - 3, W - 3

    # Batch -> lane axis; pad batch to a multiple of 128 for lane-dense vst.
    x_hwn = jnp.transpose(x_nchw[:, 0], (1, 2, 0))            # (H, W, N)
    Np = pl.cdiv(N, _LANE) * _LANE
    if Np != N:
        x_hwn = jnp.pad(x_hwn, ((0, 0), (0, 0), (0, Np - N)))

    BN = _LANE                                                # 128 images per grid step
    grid = (Np // BN,)

    out = pl.pallas_call(
        _branching_kernel,
        out_shape=jax.ShapeDtypeStruct((Ho, Wo, Np), jnp.float32),
        grid=grid,
        in_specs=[pl.BlockSpec((H, W, BN), lambda n: (0, 0, n))],
        out_specs=pl.BlockSpec((Ho, Wo, BN), lambda n: (0, 0, n)),
        compiler_params=pltpu.CompilerParams(
            dimension_semantics=("parallel",)),
        cost_estimate=pl.CostEstimate(
            flops=int(Np * (7 * (H - 1) * (W - 1) + 3 * Ho * Wo)),
            transcendentals=0,
            bytes_accessed=int(Np * (H * W + Ho * Wo) * 4),
        ),
    )(x_hwn)

    out = out[:, :, :N]                                       # drop lane padding
    return jnp.transpose(out, (2, 0, 1))[:, None]             # (N, 1, Ho, Wo)


# ----------------------------------------------------------------------------
# Pure-JAX reference (exact PyTorch semantics via lax.conv) for verification
# ----------------------------------------------------------------------------
def _make_conv_weight(out_ch, in_ch, k, value):
    w = jnp.full((out_ch, in_ch, k, k), float(value), dtype=jnp.float32)
    return w + jnp.eye(k, dtype=jnp.float32)[None, None]


def reference_forward(x_nchw):
    dn = ("NCHW", "OIHW", "NCHW")

    def conv(x, w, b):
        y = lax.conv_general_dilated(x, w, (1, 1), "VALID", dimension_numbers=dn)
        return y + b[None, :, None, None]

    w1 = _make_conv_weight(3, 1, 2, 1)
    w2 = _make_conv_weight(3, 1, 2, 2)
    w3 = _make_conv_weight(3, 1, 2, 3)
    w4 = _make_conv_weight(1, 3, 3, 10)
    w5 = _make_conv_weight(1, 3, 3, -10)
    b123 = jnp.full((3,), -2.0, dtype=jnp.float32)
    b45 = jnp.zeros((1,), dtype=jnp.float32)

    h = conv(x_nchw, w1, b123) + conv(x_nchw, w2, b123) + conv(x_nchw, w3, b123)
    h = jnp.maximum(h, 0.0)
    return conv(h, w4, b45) + conv(h, w5, b45)


if __name__ == "__main__":
    key = jax.random.PRNGKey(0)
    x = jax.random.normal(key, (2, 1, 16, 16), dtype=jnp.float32)

    out = jax.block_until_ready(pruning_branching_forward(x))
    ref = jax.block_until_ready(reference_forward(x))

    assert out.shape == (2, 1, 13, 13), out.shape
    assert jnp.allclose(out, ref, atol=1e-4, rtol=1e-4), float(jnp.max(jnp.abs(out - ref)))

    print("KERNEL_OK")
</pallas_src>

<mosaic_0001>
module attributes {stable_mosaic.version = 11 : i64} {
  func.func @_branching_kernel(%arg0: i32, %arg1: memref<16x16x128xf32, #tpu.memory_space<vmem>>, %arg2: memref<13x13x128xf32, #tpu.memory_space<vmem>>) attributes {dimension_semantics = [#tpu.dimension_semantics<parallel>], iteration_bounds = array<i64: 1>, scalar_prefetch = 0 : i64, scratch_operands = 0 : i64, tpu.core_type = #tpu.core_type<tc>, window_params = [{transform_indices = @transform_0, window_bounds = array<i64: 16, 16, 128>}, {transform_indices = @transform_1, window_bounds = array<i64: 13, 13, 128>}]} {
    %c0 = arith.constant 0 : index
    %c0_0 = arith.constant 0 : index
    %c0_1 = arith.constant 0 : index
    %0 = vector.load %arg1[%c0, %c0_0, %c0_1] : memref<16x16x128xf32, #tpu.memory_space<vmem>>, vector<16x16x128xf32>
    %1 = vector.extract_strided_slice %0 {offsets = [0, 0, 0], sizes = [15, 15, 128], strides = [1, 1, 1]} : vector<16x16x128xf32> to vector<15x15x128xf32>
    %2 = vector.extract_strided_slice %0 {offsets = [1, 1, 0], sizes = [15, 15, 128], strides = [1, 1, 1]} : vector<16x16x128xf32> to vector<15x15x128xf32>
    %3 = arith.addf %1, %2 : vector<15x15x128xf32>
    %cst = arith.constant 9.000000e+00 : f32
    %4 = vector.broadcast %cst : f32 to vector<15x15x128xf32>
    %5 = arith.mulf %4, %3 : vector<15x15x128xf32>
    %6 = vector.extract_strided_slice %0 {offsets = [0, 1, 0], sizes = [15, 15, 128], strides = [1, 1, 1]} : vector<16x16x128xf32> to vector<15x15x128xf32>
    %7 = vector.extract_strided_slice %0 {offsets = [1, 0, 0], sizes = [15, 15, 128], strides = [1, 1, 1]} : vector<16x16x128xf32> to vector<15x15x128xf32>
    %8 = arith.addf %6, %7 : vector<15x15x128xf32>
    %cst_2 = arith.constant 6.000000e+00 : f32
    %9 = vector.broadcast %cst_2 : f32 to vector<15x15x128xf32>
    %10 = arith.mulf %9, %8 : vector<15x15x128xf32>
    %11 = arith.addf %5, %10 : vector<15x15x128xf32>
    %cst_3 = arith.constant -6.000000e+00 : f32
    %12 = vector.broadcast %cst_3 : f32 to vector<15x15x128xf32>
    %13 = arith.addf %11, %12 : vector<15x15x128xf32>
    %cst_4 = arith.constant 0.000000e+00 : f32
    %14 = vector.broadcast %cst_4 : f32 to vector<15x15x128xf32>
    %15 = arith.maximumf %13, %14 : vector<15x15x128xf32>
    %16 = vector.extract_strided_slice %15 {offsets = [0, 0, 0], sizes = [13, 13, 128], strides = [1, 1, 1]} : vector<15x15x128xf32> to vector<13x13x128xf32>
    %17 = vector.extract_strided_slice %15 {offsets = [1, 1, 0], sizes = [13, 13, 128], strides = [1, 1, 1]} : vector<15x15x128xf32> to vector<13x13x128xf32>
    %18 = arith.addf %16, %17 : vector<13x13x128xf32>
    %19 = vector.extract_strided_slice %15 {offsets = [2, 2, 0], sizes = [13, 13, 128], strides = [1, 1, 1]} : vector<15x15x128xf32> to vector<13x13x128xf32>
    %20 = arith.addf %18, %19 : vector<13x13x128xf32>
    %cst_5 = arith.constant 6.000000e+00 : f32
    %21 = vector.broadcast %cst_5 : f32 to vector<13x13x128xf32>
    %22 = arith.mulf %21, %20 : vector<13x13x128xf32>
    %c0_6 = arith.constant 0 : index
    %c0_7 = arith.constant 0 : index
    %c0_8 = arith.constant 0 : index
    %23 = vector.load %arg2[%c0_6, %c0_7, %c0_8] : memref<13x13x128xf32, #tpu.memory_space<vmem>>, vector<13x13x128xf32>
    tpu.vector_store %arg2[%c0_6, %c0_7, %c0_8], %22 {strides = array<i32>} : memref<13x13x128xf32, #tpu.memory_space<vmem>>, vector<13x13x128xf32>,
    return
  }
  func.func @transform_0(%arg0: i32) -> (i32, i32, i32) {
    %c0_i32 = arith.constant 0 : i32
    %c0_i32_0 = arith.constant 0 : i32
    %c0_i32_1 = arith.constant 0 : i32
    return %c0_i32, %c0_i32_0, %arg0 : i32, i32, i32
  }
  func.func @transform_1(%arg0: i32) -> (i32, i32, i32) {
    %c0_i32 = arith.constant 0 : i32
    %c0_i32_0 = arith.constant 0 : i32
    %c0_i32_1 = arith.constant 0 : i32
    return %c0_i32, %c0_i32_0, %arg0 : i32, i32, i32
  }
}

</mosaic_0001>

<bundles_post_ra>
// kernel: pruning_branching_forward.1
= control target key start
LH: loop header
LB: loop body
LE: loop exit
PB: predicated region body
PF: predicated region fallthrough
CT: control target
= control target key end

     0   :  { %vm70_vm0 = vcmask 1046528   ;;  %vm206_vm1 = vcmask 1040384   ;;  %vm656_vm2 = vcmask 1045504   ;;  %s1261_s0 = inlined_call_operand.vmem [shape: f32[16,16,128], index: 0, kind: input, shape index: {}]   ;;  %s1262_s1 = inlined_call_operand.vmem [shape: f32[13,13,128], index: 1, kind: output, shape index: {}]  }
   0x1   :  { %v10_v0 = vld [vmem:[%s1261_s0 + $0x10] sm:$0xff]  ;;  %v11_v1 = vld [vmem:[%s1261_s0 + $0x18] sm:$0xff]  ;;  %v12_v2 = vld [vmem:[%s1261_s0 + $0x20] sm:$0xff] }
   0x2   :  { %v13_v3 = vld [vmem:[%s1261_s0 + $0x28] sm:$0xff]  ;;  %v71_v4 = vrot.slane %v10_v0, 1  ;;  %v207_v5 = vrot.slane %v10_v0, 7  ;;  %v829_v6 = vld [vmem:[%s1261_s0 + $0x30] sm:$0xff]  ;;  %v834_v7 = vld [vmem:[%s1261_s0 + $0x38] sm:$0xff]  ;;  %v72_v8 = vrot.slane %v11_v1, 1 }
   0x3   :  { %v74_v9 = vrot.slane %v12_v2, 1  ;;  %v75_v10 = vrot.slane %v13_v3, 1  ;;  %v208_v11 = vrot.slane %v11_v1, 7  ;;  %v77_v12 = vrot.slane %v829_v6, 1  ;;  %v8_v16 = vld [vmem:[%s1261_s0] sm:$0xff]  ;;  %v9_v21 = vld [vmem:[%s1261_s0 + $0x8] sm:$0xff] }
   0x4   :  { %v78_v13 = vrot.slane %v834_v7, 1  ;;  %v210_v14 = vrot.slane %v12_v2, 7  ;;  %v211_v15 = vrot.slane %v13_v3, 7  ;;  %v73_v17 = vsel %vm70_vm0, %v71_v4, %v72_v8  ;;  %v855_v46 = vld [vmem:[%s1261_s0 + $0x40] sm:$0xff]  ;;  %v860_v50 = vld [vmem:[%s1261_s0 + $0x48] sm:$0xff] }
   0x5   :  { %v76_v18 = vsel %vm70_vm0, %v74_v9, %v75_v10  ;;  %v149_v19 = vadd.f32 %v75_v10, %v11_v1  ;;  %v209_v20 = vsel %vm206_vm1, %v207_v5, %v208_v11  ;;  %v146_v23 = vadd.f32 %v73_v17, %v8_v16 }
   0x6   :  { %v79_v22 = vsel %vm70_vm0, %v77_v12, %v78_v13  ;;  %v148_v24 = vadd.f32 %v76_v18, %v10_v0  ;;  %v151_v25 = vadd.f32 %v78_v13, %v13_v3  ;;  %v212_v28 = vsel %vm206_vm1, %v210_v14, %v211_v15 }
   0x7   :  { %v150_v26 = vadd.f32 %v79_v22, %v12_v2  ;;  %v179_v27 = vmul.f32 9.0, %v149_v19  ;;  %v213_v29 = vrot.slane %v829_v6, 7  ;;  %v176_v30 = vmul.f32 9.0, %v146_v23 }
   0x8   :  { %v178_v31 = vmul.f32 9.0, %v148_v24  ;;  %v181_v32 = vmul.f32 9.0, %v151_v25  ;;  %v214_v33 = vrot.slane %v834_v7, 7  ;;  %v282_v35 = vadd.f32 %v207_v5, %v8_v16 }
   0x9   :  { %v180_v34 = vmul.f32 9.0, %v150_v26  ;;  %v283_v36 = vadd.f32 %v209_v20, %v9_v21  ;;  %v284_v37 = vadd.f32 %v210_v14, %v10_v0  ;;  %v285_v39 = vadd.f32 %v212_v28, %v11_v1 }
   0xa   :  { %v215_v38 = vsel %vm206_vm1, %v213_v29, %v214_v33  ;;  %v286_v40 = vadd.f32 %v213_v29, %v12_v2  ;;  %v147_v41 = vadd.f32 %v72_v8, %v9_v21  ;;  %v312_v43 = vmul.f32 6.0, %v282_v35 }
   0xb   :  { %v287_v42 = vadd.f32 %v215_v38, %v13_v3  ;;  %v313_v44 = vmul.f32 6.0, %v283_v36  ;;  %v314_v45 = vmul.f32 6.0, %v284_v37  ;;  %v315_v47 = vmul.f32 6.0, %v285_v39 }
   0xc   :  { %v316_v48 = vmul.f32 6.0, %v286_v40  ;;  %v177_v49 = vmul.f32 9.0, %v147_v41  ;;  %v80_v51 = vrot.slane %v855_v46, 1  ;;  %v372_v53 = vrot.slane %v312_v43, 1 }
   0xd   :  { %v317_v52 = vmul.f32 6.0, %v287_v42  ;;  %v373_v54 = vrot.slane %v313_v44, 1  ;;  %v375_v55 = vrot.slane %v314_v45, 1  ;;  %v376_v56 = vrot.slane %v315_v47, 1 }
   0xe   :  { %v378_v57 = vrot.slane %v316_v48, 1  ;;  %v81_v58 = vrot.slane %v860_v50, 1  ;;  %v216_v59 = vrot.slane %v855_v46, 7  ;;  %v217_v63 = vrot.slane %v860_v50, 7 }
   0xf   :  { %v374_v60 = vsel %vm70_vm0, %v372_v53, %v373_v54  ;;  %v379_v61 = vrot.slane %v317_v52, 1  ;;  %v448_v62 = vadd.f32 %v373_v54, %v177_v49  ;;  %v377_v0 = vsel %vm70_vm0, %v375_v55, %v376_v56 }
  0x10   :  { %v447_v1 = vadd.f32 %v374_v60, %v176_v30  ;;  %v450_v2 = vadd.f32 %v376_v56, %v179_v27  ;;  %v82_v3 = vsel %vm70_vm0, %v80_v51, %v81_v58  ;;  %v449_v5 = vadd.f32 %v377_v0, %v178_v31  ;;  %v882_v30 = vld [vmem:[%s1261_s0 + $0x50] sm:$0xff]  ;;  %v903_v60 = vld [vmem:[%s1261_s0 + $0x60] sm:$0xff] }
  0x11   :  { %v380_v4 = vsel %vm70_vm0, %v378_v57, %v379_v61  ;;  %v452_v8 = vadd.f32 %v379_v61, %v181_v32  ;;  %v478_v9 = vadd.f32 -6.0, %v448_v62  ;;  %v152_v13 = vadd.f32 %v82_v3, %v829_v6  ;;  %v908_v61 = vld [vmem:[%s1261_s0 + $0x68] sm:$0xff] }
  0x12   :  { %v451_v10 = vadd.f32 %v380_v4, %v180_v34  ;;  %v477_v11 = vadd.f32 -6.0, %v447_v1  ;;  %v480_v12 = vadd.f32 -6.0, %v450_v2  ;;  %v479_v14 = vadd.f32 -6.0, %v449_v5 }
  0x13   :  { %v482_v15 = vadd.f32 -6.0, %v452_v8  ;;  %v508_v16 = vmax.f32 %v478_v9, 0.0  ;;  %v153_v17 = vadd.f32 %v81_v58, %v834_v7  ;;  %v182_v21 = vmul.f32 9.0, %v152_v13 }
  0x14   :  { %v481_v18 = vadd.f32 -6.0, %v451_v10  ;;  %v507_v19 = vmax.f32 %v477_v11, 0.0  ;;  %v510_v20 = vmax.f32 %v480_v12, 0.0  ;;  %v509_v22 = vmax.f32 %v479_v14, 0.0 }
  0x15   :  { %v872_v23 = vmax.f32 %v482_v15, 0.0  ;;  %v183_v24 = vmul.f32 9.0, %v153_v17  ;;  %v218_v25 = vsel %vm206_vm1, %v216_v59, %v217_v63  ;;  %v288_v28 = vadd.f32 %v216_v59, %v829_v6  ;;  %v19_v6 = vld [vmem:[%s1261_s0 + $0x58] sm:$0xff] }
  0x16   :  { %v875_v26 = vmax.f32 %v481_v18, 0.0  ;;  %v564_v27 = vrot.slane %v510_v20, 1  ;;  %v289_v29 = vadd.f32 %v218_v25, %v834_v7  ;;  %v563_v31 = vrot.slane %v509_v22, 1 }
  0x17   :  { %v658_v32 = vrot.slane %v872_v23, 2  ;;  %v567_v33 = vrot.slane %v872_v23, 1  ;;  %v83_v34 = vrot.slane %v882_v30, 1  ;;  %v318_v37 = vmul.f32 6.0, %v288_v28 }
  0x18   :  { %v657_v35 = vrot.slane %v875_v26, 2  ;;  %v629_v36 = vadd.f32 %v564_v27, %v508_v16  ;;  %v319_v38 = vmul.f32 6.0, %v289_v29  ;;  %v565_v7 = vsel %vm70_vm0, %v563_v31, %v564_v27 }
  0x19   :  { %v566_v39 = vrot.slane %v875_v26, 1  ;;  %v631_v40 = vadd.f32 %v567_v33, %v510_v20  ;;  %v84_v41 = vrot.slane %v19_v6, 1  ;;  %v628_v42 = vadd.f32 %v565_v7, %v507_v19 }
  0x1a   :  { %v659_v43 = vsel %vm656_vm2, %v657_v35, %v658_v32  ;;  %v723_v44 = vadd.f32 %v658_v32, %v629_v36  ;;  %v381_v45 = vrot.slane %v318_v37, 1  ;;  %v382_v47 = vrot.slane %v319_v38, 1 }
  0x1b   :  { %v568_v48 = vsel %vm70_vm0, %v566_v39, %v567_v33  ;;  %v85_v49 = vsel %vm70_vm0, %v83_v34, %v84_v41  ;;  %v155_v51 = vadd.f32 %v84_v41, %v860_v50  ;;  %v722_v52 = vadd.f32 %v659_v43, %v628_v42  ;;  %v935_v33 = vld [vmem:[%s1261_s0 + $0x70] sm:$0xff] }
  0x1c   :  { %v749_v53 = vmul.f32 6.0, %v723_v44  ;;  %v630_v54 = vadd.f32 %v568_v48, %v509_v22  ;;  %v154_v55 = vadd.f32 %v85_v49, %v855_v46  ;;  %v383_v56 = vsel %vm70_vm0, %v381_v45, %v382_v47 }
  0x1d   :  { %v454_v57 = vadd.f32 %v382_v47, %v183_v24  ;;  %v185_v58 = vmul.f32 9.0, %v155_v51  ;;  %v219_v59 = vrot.slane %v882_v30, 7  ;;  %v748_v62 = vmul.f32 6.0, %v722_v52 }
  0x1e   :  { %775 = vst [vmem:[%s1262_s1 + $0x8] sm:$0x1f] %v749_v53  ;;  %v453_v63 = vadd.f32 %v383_v56, %v182_v21  ;;  %v184_v0 = vmul.f32 9.0, %v154_v55  ;;  %v220_v1 = vrot.slane %v19_v6, 7  ;;  %v86_v4 = vrot.slane %v903_v60, 1 }
  0x1f   :  { %v484_v2 = vadd.f32 -6.0, %v454_v57  ;;  %v290_v3 = vadd.f32 %v219_v59, %v855_v46  ;;  %v87_v5 = vrot.slane %v908_v61, 1  ;;  %774 = vst [vmem:[%s1262_s1] sm:$0xff] %v748_v62  ;;  %v222_v10 = vrot.slane %v903_v60, 7 }
  0x20   :  { %v483_v8 = vadd.f32 -6.0, %v453_v63  ;;  %v221_v9 = vsel %vm206_vm1, %v219_v59, %v220_v1  ;;  %v223_v11 = vrot.slane %v908_v61, 7  ;;  %v89_v37 = vrot.slane %v935_v33, 1 }
  0x21   :  { %v514_v12 = vmax.f32 %v484_v2, 0.0  ;;  %v291_v13 = vadd.f32 %v221_v9, %v860_v50  ;;  %v320_v14 = vmul.f32 6.0, %v290_v3  ;;  %v88_v46 = vsel %vm70_vm0, %v86_v4, %v87_v5 }
  0x22   :  { %v924_v15 = vmax.f32 %v483_v8, 0.0  ;;  %v156_v16 = vadd.f32 %v88_v46, %v882_v30  ;;  %v157_v17 = vadd.f32 %v87_v5, %v19_v6  ;;  %v224_v18 = vsel %vm206_vm1, %v222_v10, %v223_v11 }
  0x23   :  { %v661_v19 = vrot.slane %v514_v12, 2  ;;  %v321_v20 = vmul.f32 6.0, %v291_v13  ;;  %v384_v21 = vrot.slane %v320_v14, 1  ;;  %v570_v22 = vrot.slane %v514_v12, 1 }
  0x24   :  { %v660_v24 = vrot.slane %v924_v15, 2  ;;  %v569_v25 = vrot.slane %v924_v15, 1  ;;  %v186_v27 = vmul.f32 9.0, %v156_v16  ;;  %v187_v50 = vmul.f32 9.0, %v157_v17 }
  0x25   :  { %v725_v28 = vadd.f32 %v661_v19, %v631_v40  ;;  %v385_v29 = vrot.slane %v321_v20, 1  ;;  %v633_v31 = vadd.f32 %v570_v22, %v872_v23  ;;  %v292_v32 = vadd.f32 %v222_v10, %v882_v30  ;;  %v944_v23 = vld [vmem:[%s1261_s0 + $0x78] sm:$0xff] }
  0x26   :  { %v662_v34 = vsel %vm656_vm2, %v660_v24, %v661_v19  ;;  %v571_v35 = vsel %vm70_vm0, %v569_v25, %v570_v22  ;;  %v293_v36 = vadd.f32 %v224_v18, %v19_v6  ;;  %v90_v45 = vrot.slane %v944_v23, 1  ;;  %v975_v24 = vld [vmem:[%s1261_s0 + $0x80] sm:$0xff] }
  0x27   :  { %v724_v38 = vadd.f32 %v662_v34, %v630_v54  ;;  %v751_v7 = vmul.f32 6.0, %v725_v28  ;;  %v386_v39 = vsel %vm70_vm0, %v384_v21, %v385_v29  ;;  %v456_v40 = vadd.f32 %v385_v29, %v185_v58 }
  0x28   :  { %v455_v30 = vadd.f32 %v386_v39, %v184_v0  ;;  %v632_v41 = vadd.f32 %v571_v35, %v875_v26  ;;  %v322_v42 = vmul.f32 6.0, %v292_v32  ;;  %v323_v43 = vmul.f32 6.0, %v293_v36 }
  0x29   :  { %v750_v44 = vmul.f32 6.0, %v724_v38  ;;  %777 = vst [vmem:[%s1262_s1 + $0x18] sm:$0x1f] %v751_v7  ;;  %v486_v6 = vadd.f32 -6.0, %v456_v40  ;;  %v225_v47 = vrot.slane %v935_v33, 7  ;;  %v226_v52 = vrot.slane %v944_v23, 7 }
  0x2a   :  { %v485_v48 = vadd.f32 -6.0, %v455_v30  ;;  %v387_v49 = vrot.slane %v322_v42, 1  ;;  %v388_v51 = vrot.slane %v323_v43, 1  ;;  %v91_v53 = vsel %vm70_vm0, %v89_v37, %v90_v45 }
  0x2b   :  { %776 = vst [vmem:[%s1262_s1 + $0x10] sm:$0xff] %v750_v44  ;;  %v516_v26 = vmax.f32 %v486_v6, 0.0  ;;  %v159_v54 = vadd.f32 %v90_v45, %v908_v61  ;;  %v294_v55 = vadd.f32 %v225_v47, %v903_v60  ;;  %v158_v59 = vadd.f32 %v91_v53, %v903_v60 }
  0x2c   :  { %v515_v56 = vmax.f32 %v485_v48, 0.0  ;;  %v389_v57 = vsel %vm70_vm0, %v387_v49, %v388_v51  ;;  %v458_v58 = vadd.f32 %v388_v51, %v187_v50  ;;  %v227_v11 = vsel %vm206_vm1, %v225_v47, %v226_v52  ;;  %v1005_v47 = vld [vmem:[%s1261_s0 + $0x90] sm:$0xff]  ;;  %v1012_v52 = vld [vmem:[%s1261_s0 + $0x98] sm:$0xff] }
  0x2d   :  { %v664_v62 = vrot.slane %v516_v26, 2  ;;  %v457_v63 = vadd.f32 %v389_v57, %v186_v27  ;;  %v573_v0 = vrot.slane %v516_v26, 1  ;;  %v189_v1 = vmul.f32 9.0, %v159_v54 }
  0x2e   :  { %v663_v2 = vrot.slane %v515_v56, 2  ;;  %v488_v3 = vadd.f32 -6.0, %v458_v58  ;;  %v572_v4 = vrot.slane %v515_v56, 1  ;;  %v188_v5 = vmul.f32 9.0, %v158_v59 }
  0x2f   :  { %v727_v8 = vadd.f32 %v664_v62, %v633_v31  ;;  %v487_v9 = vadd.f32 -6.0, %v457_v63  ;;  %v635_v10 = vadd.f32 %v573_v0, %v514_v12  ;;  %v295_v60 = vadd.f32 %v227_v11, %v908_v61  ;;  %v986_v31 = vld [vmem:[%s1261_s0 + $0x88] sm:$0xff] }
  0x30   :  { %v665_v13 = vsel %vm656_vm2, %v663_v2, %v664_v62  ;;  %v963_v14 = vmax.f32 %v488_v3, 0.0  ;;  %v574_v46 = vsel %vm70_vm0, %v572_v4, %v573_v0  ;;  %v324_v21 = vmul.f32 6.0, %v294_v55 }
  0x31   :  { %v726_v16 = vadd.f32 %v665_v13, %v632_v41  ;;  %v753_v17 = vmul.f32 6.0, %v727_v8  ;;  %v967_v18 = vmax.f32 %v487_v9, 0.0  ;;  %v634_v19 = vadd.f32 %v574_v46, %v924_v15 }
  0x32   :  { %v667_v20 = vrot.slane %v963_v14, 2  ;;  %v325_v12 = vmul.f32 6.0, %v295_v60  ;;  %v576_v22 = vrot.slane %v963_v14, 1  ;;  %v92_v27 = vrot.slane %v975_v24, 1 }
  0x33   :  { %v752_v25 = vmul.f32 6.0, %v726_v16  ;;  %779 = vst [vmem:[%s1262_s1 + $0x28] sm:$0x1f] %v753_v17  ;;  %v666_v61 = vrot.slane %v967_v18, 2  ;;  %v575_v15 = vrot.slane %v967_v18, 1  ;;  %v390_v28 = vrot.slane %v324_v21, 1 }
  0x34   :  { %v729_v50 = vadd.f32 %v667_v20, %v635_v10  ;;  %v391_v29 = vrot.slane %v325_v12, 1  ;;  %v93_v35 = vrot.slane %v986_v31, 1  ;;  %v228_v36 = vrot.slane %v975_v24, 7  ;;  %v1041_v21 = vld [vmem:[%s1261_s0 + $0xa0] sm:$0xff] }
  0x35   :  { %778 = vst [vmem:[%s1262_s1 + $0x20] sm:$0xff] %v752_v25  ;;  %v668_v32 = vsel %vm656_vm2, %v666_v61, %v667_v20  ;;  %v577_v34 = vsel %vm70_vm0, %v575_v15, %v576_v22  ;;  %v637_v30 = vadd.f32 %v576_v22, %v516_v26  ;;  %v229_v45 = vrot.slane %v986_v31, 7  ;;  %v1049_v61 = vld [vmem:[%s1261_s0 + $0xa8] sm:$0xff] }
  0x36   :  { %v728_v37 = vadd.f32 %v668_v32, %v634_v19  ;;  %v755_v38 = vmul.f32 6.0, %v729_v50  ;;  %v392_v7 = vsel %vm70_vm0, %v390_v28, %v391_v29  ;;  %v460_v39 = vadd.f32 %v391_v29, %v189_v1 }
  0x37   :  { %v459_v40 = vadd.f32 %v392_v7, %v188_v5  ;;  %v94_v41 = vsel %vm70_vm0, %v92_v27, %v93_v35  ;;  %v161_v42 = vadd.f32 %v93_v35, %v944_v23  ;;  %v636_v6 = vadd.f32 %v577_v34, %v515_v56 }
  0x38   :  { %v754_v43 = vmul.f32 6.0, %v728_v37  ;;  %781 = vst [vmem:[%s1262_s1 + $0x38] sm:$0x1f] %v755_v38  ;;  %v490_v44 = vadd.f32 -6.0, %v460_v39  ;;  %v160_v49 = vadd.f32 %v94_v41, %v935_v33  ;;  %v296_v51 = vadd.f32 %v228_v36, %v935_v33 }
  0x39   :  { %v489_v48 = vadd.f32 -6.0, %v459_v40  ;;  %v95_v26 = vrot.slane %v1005_v47, 1  ;;  %v191_v54 = vmul.f32 9.0, %v161_v42  ;;  %v230_v55 = vsel %vm206_vm1, %v228_v36, %v229_v45  ;;  %v1067_v40 = vld [vmem:[%s1261_s0 + $0xb0] sm:$0xff] }
  0x3a   :  { %780 = vst [vmem:[%s1262_s1 + $0x30] sm:$0xff] %v754_v43  ;;  %v1018_v53 = vmax.f32 %v490_v44, 0.0  ;;  %v96_v56 = vrot.slane %v1012_v52, 1  ;;  %v297_v33 = vadd.f32 %v230_v55, %v944_v23  ;;  %v326_v58 = vmul.f32 6.0, %v296_v51 }
  0x3b   :  { %v1022_v57 = vmax.f32 %v489_v48, 0.0  ;;  %v231_v59 = vrot.slane %v1005_v47, 7  ;;  %v190_v9 = vmul.f32 9.0, %v160_v49  ;;  %v232_v60 = vrot.slane %v1012_v52, 7 }
  0x3c   :  { %v670_v62 = vrot.slane %v1018_v53, 2  ;;  %v579_v63 = vrot.slane %v1018_v53, 1  ;;  %v97_v0 = vsel %vm70_vm0, %v95_v26, %v96_v56  ;;  %v163_v1 = vadd.f32 %v96_v56, %v986_v31 }
  0x3d   :  { %v669_v2 = vrot.slane %v1022_v57, 2  ;;  %v327_v3 = vmul.f32 6.0, %v297_v33  ;;  %v393_v4 = vrot.slane %v326_v58, 1  ;;  %v578_v5 = vrot.slane %v1022_v57, 1 }
  0x3e   :  { %v731_v8 = vadd.f32 %v670_v62, %v637_v30  ;;  %v639_v23 = vadd.f32 %v579_v63, %v963_v14  ;;  %v162_v10 = vadd.f32 %v97_v0, %v975_v24  ;;  %v193_v20 = vmul.f32 9.0, %v163_v1 }
  0x3f   :  { %v671_v11 = vsel %vm656_vm2, %v669_v2, %v670_v62  ;;  %v394_v13 = vrot.slane %v327_v3, 1  ;;  %v580_v46 = vsel %vm70_vm0, %v578_v5, %v579_v63  ;;  %v233_v22 = vsel %vm206_vm1, %v231_v59, %v232_v60 }
  0x40   :  { %v730_v16 = vadd.f32 %v671_v11, %v636_v6  ;;  %v757_v17 = vmul.f32 6.0, %v731_v8  ;;  %v638_v19 = vadd.f32 %v580_v46, %v967_v18  ;;  %v298_v25 = vadd.f32 %v231_v59, %v975_v24 }
  0x41   :  { %v395_v14 = vsel %vm70_vm0, %v393_v4, %v394_v13  ;;  %v462_v12 = vadd.f32 %v394_v13, %v191_v54  ;;  %v299_v27 = vadd.f32 %v233_v22, %v986_v31  ;;  %v98_v50 = vrot.slane %v1041_v21, 1  ;;  %v1081_v4 = vld [vmem:[%s1261_s0 + $0xb8] sm:$0xff] }
  0x42   :  { %v756_v15 = vmul.f32 6.0, %v730_v16  ;;  %783 = vst [vmem:[%s1262_s1 + $0x48] sm:$0x1f] %v757_v17  ;;  %v461_v18 = vadd.f32 %v395_v14, %v190_v9  ;;  %v328_v29 = vmul.f32 6.0, %v298_v25  ;;  %v99_v32 = vrot.slane %v1049_v61, 1 }
  0x43   :  { %v492_v28 = vadd.f32 -6.0, %v462_v12  ;;  %v234_v24 = vrot.slane %v1041_v21, 7  ;;  %v192_v35 = vmul.f32 9.0, %v162_v10  ;;  %v329_v36 = vmul.f32 6.0, %v299_v27 }
  0x44   :  { %782 = vst [vmem:[%s1262_s1 + $0x40] sm:$0xff] %v756_v15  ;;  %v491_v34 = vadd.f32 -6.0, %v461_v18  ;;  %v235_v37 = vrot.slane %v1049_v61, 7  ;;  %v396_v7 = vrot.slane %v328_v29, 1  ;;  %v100_v31 = vsel %vm70_vm0, %v98_v50, %v99_v32 }
  0x45   :  { %v522_v38 = vmax.f32 %v492_v28, 0.0  ;;  %v165_v39 = vadd.f32 %v99_v32, %v1012_v52  ;;  %v397_v41 = vrot.slane %v329_v36, 1  ;;  %v164_v42 = vadd.f32 %v100_v31, %v1005_v47 }
  0x46   :  { %v521_v30 = vmax.f32 %v491_v34, 0.0  ;;  %v101_v43 = vrot.slane %v1067_v40, 1  ;;  %v236_v45 = vsel %vm206_vm1, %v234_v24, %v235_v37  ;;  %v300_v48 = vadd.f32 %v234_v24, %v1005_v47 }
  0x47   :  { %v673_v44 = vrot.slane %v522_v38, 2  ;;  %v582_v6 = vrot.slane %v522_v38, 1  ;;  %v398_v51 = vsel %vm70_vm0, %v396_v7, %v397_v41  ;;  %v464_v26 = vadd.f32 %v397_v41, %v193_v20 }
  0x48   :  { %v672_v49 = vrot.slane %v521_v30, 2  ;;  %v581_v54 = vrot.slane %v521_v30, 1  ;;  %v463_v56 = vadd.f32 %v398_v51, %v192_v35  ;;  %v195_v58 = vmul.f32 9.0, %v165_v39 }
  0x49   :  { %v733_v55 = vadd.f32 %v673_v44, %v639_v23  ;;  %v641_v33 = vadd.f32 %v582_v6, %v1018_v53  ;;  %v494_v62 = vadd.f32 -6.0, %v464_v26  ;;  %v301_v0 = vadd.f32 %v236_v45, %v1012_v52 }
  0x4a   :  { %v674_v59 = vsel %vm656_vm2, %v672_v49, %v673_v44  ;;  %v583_v63 = vsel %vm70_vm0, %v581_v54, %v582_v6  ;;  %v493_v47 = vadd.f32 -6.0, %v463_v56  ;;  %v194_v3 = vmul.f32 9.0, %v164_v42 }
  0x4b   :  { %v732_v1 = vadd.f32 %v674_v59, %v638_v19  ;;  %v759_v2 = vmul.f32 6.0, %v733_v55  ;;  %v524_v5 = vmax.f32 %v494_v62, 0.0  ;;  %v330_v8 = vmul.f32 6.0, %v300_v48 }
  0x4c   :  { %v331_v53 = vmul.f32 6.0, %v301_v0  ;;  %v102_v9 = vrot.slane %v1081_v4, 1  ;;  %v523_v52 = vmax.f32 %v493_v47, 0.0  ;;  %v640_v10 = vadd.f32 %v583_v63, %v1022_v57 }
  0x4d   :  { %v758_v23 = vmul.f32 6.0, %v732_v1  ;;  %785 = vst [vmem:[%s1262_s1 + $0x58] sm:$0x1f] %v759_v2  ;;  %v237_v11 = vrot.slane %v1067_v40, 7  ;;  %v676_v13 = vrot.slane %v524_v5, 2  ;;  %v399_v46 = vrot.slane %v330_v8, 1 }
  0x4e   :  { %v400_v60 = vrot.slane %v331_v53, 1  ;;  %v585_v16 = vrot.slane %v524_v5, 1  ;;  %v675_v17 = vrot.slane %v523_v52, 2  ;;  %v584_v19 = vrot.slane %v523_v52, 1  ;;  %v1134_v8 = vld [vmem:[%s1261_s0 + $0xd0] sm:$0xff] }
  0x4f   :  { %784 = vst [vmem:[%s1262_s1 + $0x50] sm:$0xff] %v758_v23  ;;  %v103_v20 = vsel %vm70_vm0, %v101_v43, %v102_v9  ;;  %v238_v14 = vrot.slane %v1081_v4, 7  ;;  %v735_v12 = vadd.f32 %v676_v13, %v641_v33  ;;  %v167_v25 = vadd.f32 %v102_v9, %v1049_v61 }
  0x50   :  { %v401_v22 = vsel %vm70_vm0, %v399_v46, %v400_v60  ;;  %v466_v57 = vadd.f32 %v400_v60, %v195_v58  ;;  %v677_v15 = vsel %vm656_vm2, %v675_v17, %v676_v13  ;;  %v586_v27 = vsel %vm70_vm0, %v584_v19, %v585_v16 }
  0x51   :  { %v465_v18 = vadd.f32 %v401_v22, %v194_v3  ;;  %v166_v50 = vadd.f32 %v103_v20, %v1041_v21  ;;  %v734_v28 = vadd.f32 %v677_v15, %v640_v10  ;;  %v761_v29 = vmul.f32 6.0, %v735_v12 }
  0x52   :  { %v496_v32 = vadd.f32 -6.0, %v466_v57  ;;  %v643_v24 = vadd.f32 %v585_v16, %v522_v38  ;;  %v642_v35 = vadd.f32 %v586_v27, %v521_v30  ;;  %v239_v37 = vsel %vm206_vm1, %v237_v11, %v238_v14  ;;  %v32_v38 = vld [vmem:[%s1261_s0 + $0xc0] sm:$0xff]  ;;  %v1113_v30 = vld [vmem:[%s1261_s0 + $0xc8] sm:$0xff] }
  0x53   :  { %v495_v34 = vadd.f32 -6.0, %v465_v18  ;;  %v196_v36 = vmul.f32 9.0, %v166_v50  ;;  %v760_v7 = vmul.f32 6.0, %v734_v28  ;;  %787 = vst [vmem:[%s1262_s1 + $0x68] sm:$0x1f] %v761_v29  ;;  %v302_v39 = vadd.f32 %v237_v11, %v1041_v21 }
  0x54   :  { %v1103_v31 = vmax.f32 %v496_v32, 0.0  ;;  %v303_v41 = vadd.f32 %v239_v37, %v1049_v61  ;;  %v197_v43 = vmul.f32 9.0, %v167_v25  ;;  %v104_v44 = vrot.slane %v32_v38, 1 }
  0x55   :  { %v1115_v42 = vmax.f32 %v495_v34, 0.0  ;;  %v105_v6 = vrot.slane %v1113_v30, 1  ;;  %786 = vst [vmem:[%s1262_s1 + $0x60] sm:$0xff] %v760_v7  ;;  %v332_v61 = vmul.f32 6.0, %v302_v39  ;;  %v240_v58 = vrot.slane %v32_v38, 7 }
  0x56   :  { %v679_v21 = vrot.slane %v1103_v31, 2  ;;  %v333_v45 = vmul.f32 6.0, %v303_v41  ;;  %v588_v48 = vrot.slane %v1103_v31, 1  ;;  %v241_v10 = vrot.slane %v1113_v30, 7 }
  0x57   :  { %v678_v49 = vrot.slane %v1115_v42, 2  ;;  %v587_v51 = vrot.slane %v1115_v42, 1  ;;  %v106_v26 = vsel %vm70_vm0, %v104_v44, %v105_v6  ;;  %v169_v54 = vadd.f32 %v105_v6, %v1081_v4 }
  0x58   :  { %v737_v55 = vadd.f32 %v679_v21, %v643_v24  ;;  %v402_v56 = vrot.slane %v332_v61, 1  ;;  %v403_v33 = vrot.slane %v333_v45, 1  ;;  %v645_v63 = vadd.f32 %v588_v48, %v524_v5  ;;  %v1140_v5 = vld [vmem:[%s1261_s0 + $0xd8] sm:$0xff] }
  0x59   :  { %v680_v59 = vsel %vm656_vm2, %v678_v49, %v679_v21  ;;  %v589_v62 = vsel %vm70_vm0, %v587_v51, %v588_v48  ;;  %v168_v0 = vadd.f32 %v106_v26, %v1067_v40  ;;  %v199_v23 = vmul.f32 9.0, %v169_v54  ;;  %v1169_v49 = vld [vmem:[%s1261_s0 + $0xe0] sm:$0xff]  ;;  %v1174_v51 = vld [vmem:[%s1261_s0 + $0xe8] sm:$0xff] }
  0x5a   :  { %v736_v1 = vadd.f32 %v680_v59, %v642_v35  ;;  %v763_v2 = vmul.f32 6.0, %v737_v55  ;;  %v404_v47 = vsel %vm70_vm0, %v402_v56, %v403_v33  ;;  %v468_v3 = vadd.f32 %v403_v33, %v197_v43 }
  0x5b   :  { %v467_v53 = vadd.f32 %v404_v47, %v196_v36  ;;  %v644_v9 = vadd.f32 %v589_v62, %v523_v52  ;;  %v304_v46 = vadd.f32 %v240_v58, %v1067_v40  ;;  %v107_v60 = vrot.slane %v1134_v8, 1 }
  0x5c   :  { %v762_v11 = vmul.f32 6.0, %v736_v1  ;;  %789 = vst [vmem:[%s1262_s1 + $0x78] sm:$0x1f] %v763_v2  ;;  %v498_v13 = vadd.f32 -6.0, %v468_v3  ;;  %v242_v52 = vsel %vm206_vm1, %v240_v58, %v241_v10  ;;  %v108_v17 = vrot.slane %v1140_v5, 1 }
  0x5d   :  { %v497_v16 = vadd.f32 -6.0, %v467_v53  ;;  %v243_v19 = vrot.slane %v1134_v8, 7  ;;  %v305_v14 = vadd.f32 %v242_v52, %v1081_v4  ;;  %v334_v12 = vmul.f32 6.0, %v304_v46 }
  0x5e   :  { %788 = vst [vmem:[%s1262_s1 + $0x70] sm:$0xff] %v762_v11  ;;  %v528_v20 = vmax.f32 %v498_v13, 0.0  ;;  %v244_v22 = vrot.slane %v1140_v5, 7  ;;  %v198_v57 = vmul.f32 9.0, %v168_v0  ;;  %v109_v25 = vsel %vm70_vm0, %v107_v60, %v108_v17 }
  0x5f   :  { %v1155_v40 = vmax.f32 %v497_v16, 0.0  ;;  %v171_v15 = vadd.f32 %v108_v17, %v1113_v30  ;;  %v335_v27 = vmul.f32 6.0, %v305_v14  ;;  %v405_v50 = vrot.slane %v334_v12, 1 }
  0x60   :  { %v682_v18 = vrot.slane %v528_v20, 2  ;;  %v591_v28 = vrot.slane %v528_v20, 1  ;;  %v170_v24 = vadd.f32 %v109_v25, %v32_v38  ;;  %v306_v4 = vadd.f32 %v243_v19, %v32_v38 }
  0x61   :  { %v681_v29 = vrot.slane %v1155_v40, 2  ;;  %v590_v32 = vrot.slane %v1155_v40, 1  ;;  %v406_v35 = vrot.slane %v335_v27, 1  ;;  %v245_v36 = vsel %vm206_vm1, %v243_v19, %v244_v22 }
  0x62   :  { %v739_v34 = vadd.f32 %v682_v18, %v645_v63  ;;  %v201_v39 = vmul.f32 9.0, %v171_v15  ;;  %v307_v41 = vadd.f32 %v245_v36, %v1113_v30  ;;  %v200_v45 = vmul.f32 9.0, %v170_v24 }
  0x63   :  { %v683_v37 = vsel %vm656_vm2, %v681_v29, %v682_v18  ;;  %v592_v7 = vsel %vm70_vm0, %v590_v32, %v591_v28  ;;  %v407_v6 = vsel %vm70_vm0, %v405_v50, %v406_v35  ;;  %v470_v21 = vadd.f32 %v406_v35, %v199_v23 }
  0x64   :  { %v738_v43 = vadd.f32 %v683_v37, %v644_v9  ;;  %v765_v44 = vmul.f32 6.0, %v739_v34  ;;  %v469_v61 = vadd.f32 %v407_v6, %v198_v57  ;;  %v336_v48 = vmul.f32 6.0, %v306_v4 }
  0x65   :  { %v337_v38 = vmul.f32 6.0, %v307_v41  ;;  %v500_v26 = vadd.f32 -6.0, %v470_v21  ;;  %v110_v54 = vrot.slane %v1169_v49, 1  ;;  %v111_v55 = vrot.slane %v1174_v51, 1 }
  0x66   :  { %v764_v30 = vmul.f32 6.0, %v738_v43  ;;  %791 = vst [vmem:[%s1262_s1 + $0x88] sm:$0x1f] %v765_v44  ;;  %v499_v56 = vadd.f32 -6.0, %v469_v61  ;;  %v408_v33 = vrot.slane %v336_v48, 1  ;;  %v647_v62 = vadd.f32 %v591_v28, %v1103_v31  ;;  %v38_v28 = vld [vmem:[%s1261_s0 + $0xf0] sm:$0xff] }
  0x67   :  { %v409_v58 = vrot.slane %v337_v38, 1  ;;  %v1184_v59 = vmax.f32 %v500_v26, 0.0  ;;  %v246_v63 = vrot.slane %v1169_v49, 7  ;;  %v247_v0 = vrot.slane %v1174_v51, 7 }
  0x68   :  { %790 = vst [vmem:[%s1262_s1 + $0x80] sm:$0xff] %v764_v30  ;;  %v1189_v1 = vmax.f32 %v499_v56, 0.0  ;;  %v646_v2 = vadd.f32 %v592_v7, %v1115_v42  ;;  %v112_v10 = vsel %vm70_vm0, %v110_v54, %v111_v55  ;;  %v173_v46 = vadd.f32 %v111_v55, %v1140_v5 }
  0x69   :  { %v410_v47 = vsel %vm70_vm0, %v408_v33, %v409_v58  ;;  %v472_v3 = vadd.f32 %v409_v58, %v201_v39  ;;  %v685_v53 = vrot.slane %v1184_v59, 2  ;;  %v594_v23 = vrot.slane %v1184_v59, 1 }
  0x6a   :  { %v471_v9 = vadd.f32 %v410_v47, %v200_v45  ;;  %v684_v31 = vrot.slane %v1189_v1, 2  ;;  %v593_v13 = vrot.slane %v1189_v1, 1  ;;  %v248_v52 = vsel %vm206_vm1, %v246_v63, %v247_v0 }
  0x6b   :  { %v502_v11 = vadd.f32 -6.0, %v472_v3  ;;  %v741_v60 = vadd.f32 %v685_v53, %v647_v62  ;;  %v649_v42 = vadd.f32 %v594_v23, %v528_v20  ;;  %v308_v12 = vadd.f32 %v246_v63, %v1134_v8 }
  0x6c   :  { %v501_v16 = vadd.f32 -6.0, %v471_v9  ;;  %v686_v17 = vsel %vm656_vm2, %v684_v31, %v685_v53  ;;  %v595_v14 = vsel %vm70_vm0, %v593_v13, %v594_v23  ;;  %v172_v15 = vadd.f32 %v112_v10, %v1134_v8 }
  0x6d   :  { %v1201_v19 = vmax.f32 %v502_v11, 0.0  ;;  %v740_v22 = vadd.f32 %v686_v17, %v646_v2  ;;  %v767_v57 = vmul.f32 6.0, %v741_v60  ;;  %v648_v18 = vadd.f32 %v595_v14, %v1155_v40 }
  0x6e   :  { %v1205_v25 = vmax.f32 %v501_v16, 0.0  ;;  %v309_v27 = vadd.f32 %v248_v52, %v1140_v5  ;;  %v338_v50 = vmul.f32 6.0, %v308_v12  ;;  %v113_v24 = vrot.slane %v38_v28, 1  ;;  %v39_v5 = vld [vmem:[%s1261_s0 + $0xf8] sm:$0xff] }
  0x6f   :  { %v688_v20 = vrot.slane %v1201_v19, 2  ;;  %v766_v29 = vmul.f32 6.0, %v740_v22  ;;  %793 = vst [vmem:[%s1262_s1 + $0x98] sm:$0x1f] %v767_v57  ;;  %v203_v4 = vmul.f32 9.0, %v173_v46  ;;  %v202_v36 = vmul.f32 9.0, %v172_v15 }
  0x70   :  { %v687_v32 = vrot.slane %v1205_v25, 2  ;;  %v339_v40 = vmul.f32 6.0, %v309_v27  ;;  %v411_v34 = vrot.slane %v338_v50, 1  ;;  %v114_v37 = vrot.slane %v39_v5, 1 }
  0x71   :  { %v743_v8 = vadd.f32 %v688_v20, %v649_v42  ;;  %792 = vst [vmem:[%s1262_s1 + $0x90] sm:$0xff] %v766_v29  ;;  %v249_v7 = vrot.slane %v38_v28, 7  ;;  %v597_v44 = vrot.slane %v1201_v19, 1  ;;  %v596_v6 = vrot.slane %v1205_v25, 1 }
  0x72   :  { %v689_v35 = vsel %vm656_vm2, %v687_v32, %v688_v20  ;;  %v412_v43 = vrot.slane %v339_v40, 1  ;;  %v115_v21 = vsel %vm70_vm0, %v113_v24, %v114_v37  ;;  %v250_v61 = vrot.slane %v39_v5, 7 }
  0x73   :  { %v742_v39 = vadd.f32 %v689_v35, %v648_v18  ;;  %v769_v41 = vmul.f32 6.0, %v743_v8  ;;  %v310_v45 = vadd.f32 %v249_v7, %v1169_v49  ;;  %v175_v26 = vadd.f32 %v114_v37, %v1174_v51 }
  0x74   :  { %v413_v38 = vsel %vm70_vm0, %v411_v34, %v412_v43  ;;  %v474_v30 = vadd.f32 %v412_v43, %v203_v4  ;;  %v174_v55 = vadd.f32 %v115_v21, %v1169_v49  ;;  %v251_v56 = vsel %vm206_vm1, %v249_v7, %v250_v61 }
  0x75   :  { %v768_v48 = vmul.f32 6.0, %v742_v39  ;;  %795 = vst [vmem:[%s1262_s1 + $0xa8] sm:$0x1f] %v769_v41  ;;  %v473_v54 = vadd.f32 %v413_v38, %v202_v36  ;;  %v340_v33 = vmul.f32 6.0, %v310_v45  ;;  %v311_v62 = vadd.f32 %v251_v56, %v1174_v51 }
  0x76   :  { %v504_v58 = vadd.f32 -6.0, %v474_v30  ;;  %v598_v0 = vsel %vm70_vm0, %v596_v6, %v597_v44  ;;  %v651_v2 = vadd.f32 %v597_v44, %v1184_v59  ;;  %v205_v3 = vmul.f32 9.0, %v175_v26 }
  0x77   :  { %794 = vst [vmem:[%s1262_s1 + $0xa0] sm:$0xff] %v768_v48  ;;  %v503_v63 = vadd.f32 -6.0, %v473_v54  ;;  %v341_v53 = vmul.f32 6.0, %v311_v62  ;;  %v414_v9 = vrot.slane %v340_v33, 1  ;;  %v204_v23 = vmul.f32 9.0, %v174_v55 }
  0x78   :  { %v534_v47 = vmax.f32 %v504_v58, 0.0  ;;  %v650_v10 = vadd.f32 %v598_v0, %v1189_v1 }
  0x79   :  { %v533_v49 = vmax.f32 %v503_v63, 0.0  ;;  %v415_v11 = vrot.slane %v341_v53, 1 }
  0x7a   :  { %v691_v31 = vrot.slane %v534_v47, 2  ;;  %v600_v60 = vrot.slane %v534_v47, 1 }
  0x7b   :  { %v690_v13 = vrot.slane %v533_v49, 2  ;;  %v599_v46 = vrot.slane %v533_v49, 1  ;;  %v416_v51 = vsel %vm70_vm0, %v414_v9, %v415_v11  ;;  %v476_v42 = vadd.f32 %v415_v11, %v205_v3 }
  0x7c   :  { %v745_v16 = vadd.f32 %v691_v31, %v651_v2  ;;  %v475_v59 = vadd.f32 %v416_v51, %v204_v23  ;;  %v653_v18 = vadd.f32 %v600_v60, %v1201_v19 }
  0x7d   :  { %v692_v52 = vsel %vm656_vm2, %v690_v13, %v691_v31  ;;  %v506_v12 = vadd.f32 -6.0, %v476_v42  ;;  %v601_v57 = vsel %vm70_vm0, %v599_v46, %v600_v60 }
  0x7e   :  { %v744_v17 = vadd.f32 %v692_v52, %v650_v10  ;;  %v771_v14 = vmul.f32 6.0, %v745_v16  ;;  %v505_v22 = vadd.f32 -6.0, %v475_v59  ;;  %v652_v27 = vadd.f32 %v601_v57, %v1205_v25 }
  0x7f   :  { %v536_v1 = vmax.f32 %v506_v12, 0.0 }
  0x80   :  { %v770_v15 = vmul.f32 6.0, %v744_v17  ;;  %797 = vst [vmem:[%s1262_s1 + $0xb8] sm:$0x1f] %v771_v14  ;;  %v535_v20 = vmax.f32 %v505_v22, 0.0 }
  0x81   :  { %v694_v50 = vrot.slane %v536_v1, 2 }
  0x82   :  { %796 = vst [vmem:[%s1262_s1 + $0xb0] sm:$0xff] %v770_v15  ;;  %v693_v28 = vrot.slane %v535_v20, 2 }
  0x83   :  { %v747_v29 = vadd.f32 %v694_v50, %v653_v18 }
  0x84   :  { %v695_v32 = vsel %vm656_vm2, %v693_v28, %v694_v50 }
  0x85   :  { %v746_v24 = vadd.f32 %v695_v32, %v652_v27  ;;  %v773_v8 = vmul.f32 6.0, %v747_v29 }
  0x87   :  { %v772_v4 = vmul.f32 6.0, %v746_v24  ;;  %799 = vst [vmem:[%s1262_s1 + $0xc8] sm:$0x1f] %v773_v8 }
  0x89   :  { %798 = vst [vmem:[%s1262_s1 + $0xc0] sm:$0xff] %v772_v4 }

</bundles_post_ra>
